<compile_context>
chip_gen: v5e
topology: v5e:2x2
jax: 0.10.0
libtpu: 0.0.40
codegen_flags: <defaults>
</compile_context>

<pallas_src>
import math

import numpy as np

import jax
import jax.numpy as jnp
from jax.experimental import pallas as pl
from jax.experimental.pallas import tpu as pltpu


_VMEM_LIMIT_BYTES = 48 * 1024 * 1024     # safe on v5e/v6e (128 MiB) and v7x (64 MiB)
_BLOCK_BUDGET_BYTES = 4 * 1024 * 1024    # per-grid-step working-set target
_FUSED_SEL_MAX_BYTES = 4 * 1024 * 1024   # gate for the fused (flattened-spatial) path


# ----------------------------- kernels --------------------------------------


def _interp_fused_kernel(x_ref, sel_ref, o_ref):
    # x_ref  : (TNC, H*W)            flattened spatial plane per (n, c)
    # sel_ref: (H*W, outH*outW)      one-hot "nearest" selection matrix
    # o_ref  : (TNC, outH*outW)      lane-dense output block
    out = jnp.dot(x_ref[...], sel_ref[...], preferred_element_type=jnp.float32)
    o_ref[...] = out.astype(o_ref.dtype)


def _interp_2step_kernel(sh_ref, x_ref, swt_ref, o_ref):
    # sh_ref : (outH, H)   one-hot row selection
    # x_ref  : (TNC, H, W)
    # swt_ref: (W, outW)   transposed one-hot column selection
    # o_ref  : (TNC, outH, outW)
    x = x_ref[...]
    tnc = x.shape[0]
    out_h, in_h = sh_ref.shape
    in_w, out_w = swt_ref.shape

    # Row (H) selection as a batched MXU matmul; keep the intermediate in the
    # input dtype (one-hot selection is exact in bf16 -> halves step-2 bandwidth).
    sh_b = jnp.broadcast_to(sh_ref[...][None, :, :], (tnc, out_h, in_h))
    y = jnp.einsum("bij,bjk->bik", sh_b, x,
                   preferred_element_type=jnp.float32).astype(x.dtype)

    # Column (W) selection as a batched MXU matmul.
    swt_b = jnp.broadcast_to(swt_ref[...][None, :, :], (tnc, in_w, out_w))
    out = jnp.einsum("bij,bjk->bik", y, swt_b,
                     preferred_element_type=jnp.float32)
    o_ref[...] = out.astype(o_ref.dtype)


# ----------------------------- host-side glue --------------------------------


def _nearest_src_indices(in_size, out_size, scale_factor):
    """Source index per output index, matching PyTorch mode='nearest'."""
    d = np.arange(out_size, dtype=np.float32)
    if scale_factor is not None:
        step = np.float32(1.0) / np.float32(scale_factor)   # torch uses 1/scale
    else:
        step = np.float32(in_size) / np.float32(out_size)
    src = np.floor(d * step).astype(np.int32)
    return np.clip(src, 0, in_size - 1)


def _one_hot_np(idx, depth):
    m = np.zeros((idx.shape[0], depth), dtype=np.float32)
    m[np.arange(idx.shape[0]), idx] = 1.0
    return m


def _choose_block(nc, per_plane_bytes, multiple):
    """Pick the per-step N*C block size (as large as the VMEM budget allows)."""
    cap = max(1, _BLOCK_BUDGET_BYTES // max(per_plane_bytes, 1))
    tnc = min(nc, cap)
    # When the whole problem would fit one step but there is enough work,
    # expose >=2 "parallel" grid steps so v7x's two TensorCores both get blocks.
    if tnc >= nc and nc >= 4 * multiple:
        tnc = -(-nc // 2)
    tnc = -(-tnc // multiple) * multiple          # sublane-align 2-D blocks
    nc_pad = -(-nc // tnc) * tnc
    return tnc, nc_pad


def interpolate_nearest(x, size=None, scale_factor=None):
    assert x.ndim == 4, "expected NCHW input"
    assert (size is not None) or (scale_factor is not None), \
        "either size or scale_factor must be given"
    n, c, h, w = x.shape

    if size is not None:
        if isinstance(size, (tuple, list)):
            out_h, out_w = int(size[0]), int(size[1])
        else:
            out_h = out_w = int(size)
        scale_h = scale_w = None
    else:
        if isinstance(scale_factor, (tuple, list)):
            scale_h, scale_w = float(scale_factor[0]), float(scale_factor[1])
        else:
            scale_h = scale_w = float(scale_factor)
        out_h = int(math.floor(h * scale_h))
        out_w = int(math.floor(w * scale_w))

    h_idx = _nearest_src_indices(h, out_h, scale_h)   # (out_h,)
    w_idx = _nearest_src_indices(w, out_w, scale_w)   # (out_w,)

    orig_dtype = x.dtype
    if not jnp.issubdtype(orig_dtype, jnp.floating):
        # No integer matmul on v7x MXU; selection through f32 is exact for
        # |v| < 2**24, then cast back.
        x = x.astype(jnp.float32)
    compute_dtype = x.dtype
    itemsize = jnp.dtype(compute_dtype).itemsize

    nc = n * c
    bytes_moved = nc * (h * w + out_h * out_w) * itemsize
    cost = pl.CostEstimate(flops=0, transcendentals=0, bytes_accessed=bytes_moved)
    sel_bytes = (h * w) * (out_h * out_w) * itemsize
    dim_sem = ("parallel",)

    if sel_bytes <= _FUSED_SEL_MAX_BYTES:
        # -------- fused path: one lane-dense selection matmul ----------------
        src = (h_idx[:, None] * w + w_idx[None, :]).reshape(-1)   # (out_h*out_w,)
        sel_np = np.zeros((h * w, out_h * out_w), dtype=np.float32)
        sel_np[src, np.arange(out_h * out_w)] = 1.0
        sel = jnp.asarray(sel_np, dtype=compute_dtype)

        per_plane = (h * w + out_h * out_w) * itemsize
        tnc, nc_pad = _choose_block(nc, per_plane, multiple=8)

        x2 = x.reshape(nc, h * w)
        if nc_pad != nc:
            x2 = jnp.pad(x2, ((0, nc_pad - nc), (0, 0)))

        out2 = pl.pallas_call(
            _interp_fused_kernel,
            out_shape=jax.ShapeDtypeStruct((nc_pad, out_h * out_w), compute_dtype),
            grid_spec=pltpu.PrefetchScalarGridSpec(
                num_scalar_prefetch=0,
                grid=(nc_pad // tnc,),
                in_specs=[
                    pl.BlockSpec((tnc, h * w), lambda i: (i, 0)),
                    pl.BlockSpec((h * w, out_h * out_w), lambda i: (0, 0)),
                ],
                out_specs=pl.BlockSpec((tnc, out_h * out_w), lambda i: (i, 0)),
            ),
            compiler_params=pltpu.CompilerParams(
                dimension_semantics=dim_sem,
                vmem_limit_bytes=_VMEM_LIMIT_BYTES,
            ),
            cost_estimate=cost,
        )(x2, sel)
        out = out2[:nc].reshape(n, c, out_h, out_w)
    else:
        # -------- general path: batched row/column selection matmuls ---------
        sh = jnp.asarray(_one_hot_np(h_idx, h), dtype=compute_dtype)      # (out_h, h)
        swt = jnp.asarray(_one_hot_np(w_idx, w).T, dtype=compute_dtype)   # (w, out_w)

        per_plane = itemsize * (h * w + out_h * out_w + out_h * w
                                + out_h * h + w * out_w) + 4 * out_h * w
        # TODO(synk): for single planes larger than the block budget, additionally
        # tile the out_h axis instead of relying on tnc == 1.
        tnc, nc_pad = _choose_block(nc, per_plane, multiple=1)

        x3 = x.reshape(nc, h, w)
        if nc_pad != nc:
            x3 = jnp.pad(x3, ((0, nc_pad - nc), (0, 0), (0, 0)))

        out3 = pl.pallas_call(
            _interp_2step_kernel,
            out_shape=jax.ShapeDtypeStruct((nc_pad, out_h, out_w), compute_dtype),
            grid_spec=pltpu.PrefetchScalarGridSpec(
                num_scalar_prefetch=0,
                grid=(nc_pad // tnc,),
                in_specs=[
                    pl.BlockSpec((out_h, h), lambda i: (0, 0)),
                    pl.BlockSpec((tnc, h, w), lambda i: (i, 0, 0)),
                    pl.BlockSpec((w, out_w), lambda i: (0, 0)),
                ],
                out_specs=pl.BlockSpec((tnc, out_h, out_w), lambda i: (i, 0, 0)),
            ),
            compiler_params=pltpu.CompilerParams(
                dimension_semantics=dim_sem,
                vmem_limit_bytes=_VMEM_LIMIT_BYTES,
            ),
            cost_estimate=cost,
        )(sh, x3, swt)
        out = out3[:nc].reshape(n, c, out_h, out_w)

    if out.dtype != orig_dtype:
        out = out.astype(orig_dtype)
    return out


class Interpolate:
    """Pallas equivalent of the nn.Module wrapper for F.interpolate (mode='nearest')."""

    def __init__(self, size=None, scale_factor=None):
        self.size, self.scale_factor = size, scale_factor

    def __call__(self, x):
        return interpolate_nearest(x, self.size, self.scale_factor)


if __name__ == "__main__":
    key = jax.random.PRNGKey(0)

    # 1) Small-spatial (fused, lane-dense) path: 16x16 -> 32x32 via scale_factor=2.
    x = jax.random.normal(key, (2, 4, 16, 16), dtype=jnp.float32)
    out = jax.block_until_ready(Interpolate(scale_factor=2)(x))
    assert out.shape == (2, 4, 32, 32), out.shape
    ref = jnp.repeat(jnp.repeat(x, 2, axis=2), 2, axis=3)
    assert jnp.allclose(out, ref, atol=1e-6), "fused path mismatch vs nearest reference"

    # 2) Larger-spatial (two-step batched) path: 32x32 -> 64x64 via size=.
    x2 = jax.random.normal(jax.random.PRNGKey(0), (2, 4, 32, 32), dtype=jnp.float32)
    out2 = jax.block_until_ready(Interpolate(size=(64, 64))(x2))
    assert out2.shape == (2, 4, 64, 64), out2.shape
    ref2 = jnp.repeat(jnp.repeat(x2, 2, axis=2), 2, axis=3)
    assert jnp.allclose(out2, ref2, atol=1e-6), "two-step path mismatch vs nearest reference"

    print("KERNEL_OK")
</pallas_src>

<mosaic_0001>
module attributes {stable_mosaic.version = 11 : i64} {
  func.func @_interp_fused_kernel(%arg0: i32, %arg1: memref<8x256xf32, #tpu.memory_space<vmem>>, %arg2: memref<256x1024xf32, #tpu.memory_space<vmem>>, %arg3: memref<8x1024xf32, #tpu.memory_space<vmem>>) attributes {dimension_semantics = [#tpu.dimension_semantics<parallel>], iteration_bounds = array<i64: 1>, scalar_prefetch = 0 : i64, scratch_operands = 0 : i64, tpu.core_type = #tpu.core_type<tc>, window_params = [{transform_indices = @transform_0, window_bounds = array<i64: 8, 256>}, {pipeline_mode = #tpu.pipeline_mode<synchronous>, transform_indices = @transform_1, window_bounds = array<i64: 256, 1024>}, {transform_indices = @transform_2, window_bounds = array<i64: 8, 1024>}]} {
    %c0 = arith.constant 0 : index
    %c0_0 = arith.constant 0 : index
    %0 = vector.load %arg1[%c0, %c0_0] : memref<8x256xf32, #tpu.memory_space<vmem>>, vector<8x256xf32>
    %c0_1 = arith.constant 0 : index
    %c0_2 = arith.constant 0 : index
    %1 = vector.load %arg2[%c0_1, %c0_2] : memref<256x1024xf32, #tpu.memory_space<vmem>>, vector<256x1024xf32>
    %cst = arith.constant dense<0.000000e+00> : vector<8x1024xf32>
    %2 = tpu.matmul %0, %1, %cst {dimension_numbers = #tpu.dot_dimension_numbers<[1], [0], [0], [1], [0, 0, 1, 1], [], []>} : vector<8x256xf32>, vector<256x1024xf32>, vector<8x1024xf32> -> vector<8x1024xf32>
    %c0_3 = arith.constant 0 : index
    %c0_4 = arith.constant 0 : index
    %3 = vector.load %arg3[%c0_3, %c0_4] : memref<8x1024xf32, #tpu.memory_space<vmem>>, vector<8x1024xf32>
    tpu.vector_store %arg3[%c0_3, %c0_4], %2 {strides = array<i32>} : memref<8x1024xf32, #tpu.memory_space<vmem>>, vector<8x1024xf32>,
    return
  }
  func.func @transform_0(%arg0: i32) -> (i32, i32) {
    %c0_i32 = arith.constant 0 : i32
    %c0_i32_0 = arith.constant 0 : i32
    return %arg0, %c0_i32 : i32, i32
  }
  func.func @transform_1(%arg0: i32) -> (i32, i32) {
    %c0_i32 = arith.constant 0 : i32
    %c0_i32_0 = arith.constant 0 : i32
    %c0_i32_1 = arith.constant 0 : i32
    return %c0_i32, %c0_i32_0 : i32, i32
  }
  func.func @transform_2(%arg0: i32) -> (i32, i32) {
    %c0_i32 = arith.constant 0 : i32
    %c0_i32_0 = arith.constant 0 : i32
    return %arg0, %c0_i32 : i32, i32
  }
}

</mosaic_0001>

<bundles_post_ra>
// kernel: tpu_custom_call.1
= control target key start
LH: loop header
LB: loop body
LE: loop exit
PB: predicated region body
PF: predicated region fallthrough
CT: control target
= control target key end

     0   :  { %7 = vsyncpa [#allocation3], 0  ;;  %s778_s0 = inlined_call_operand.hbm [shape: f32[8,256], index: 0, kind: input, shape index: {}]   ;;  %s779_s1 = inlined_call_operand.hbm [shape: f32[256,1024], index: 1, kind: input, shape index: {}]   ;;  %s780_s2 = inlined_call_operand.hbm [shape: f32[8,1024], index: 2, kind: output, shape index: {}]  }
   0x1   :  { %8 = vsyncpa [#allocation6], 0 }
   0x2   :  { %9 = vsyncpa [#allocation4], 0  ;;  %s15_s11 = sshll.u32 %s778_s0, 4  ;;  %s729_s12 = smov [#allocation2]   ;;  %s16_s11 = int_to_ptr.hbm [resolvable:$true] %s15_s11 }
   0x3   :  { %s17_s13 = sshll.u32 %s729_s12, 4  ;;  %s25_s16 = sshll.u32 %s779_s1, 4  ;;  %s18_s13 = int_to_ptr.vmem [resolvable:$true] %s17_s13  ;;  %s26_s16 = int_to_ptr.hbm [resolvable:$true] %s25_s16 }
   0x4   :  { %20 = dma.hbm_to_vmem [thread:$0]  %s16_s11, 256, %s18_s13, [#allocation3]  }
   0x5   :  { %s730_s17 = smov [#allocation5]   ;;  %s731_s19 = smov 1024  }
   0x6   :  { %s27_s18 = sshll.u32 %s730_s17, 4  ;;  %s732_s20 = smov 64   ;;  %s28_s18 = int_to_ptr.vmem [resolvable:$true] %s27_s18 }
   0x7   :  { %33 = dma.hbm_to_vmem [thread:$0]  %s26_s16, 32768, %s28_s18, [#allocation6], %s731_s19, %s731_s19, %s732_s20  }
   0x8   :  { %723 = dma.done.wait [#allocation3], 256  }
   0x9   :  { %724 = vsyncadd [#allocation3], 4294967040 }
   0xa   :  { %725 = dma.done.wait [#allocation6], 32768  }
   0xb   :  { %726 = vsyncadd [#allocation6], 4294934528  ;;  %v165_v0 = vld [vmem:[#allocation5 + $0x3c8] sm:$0xff]  ;;  %v164_v6 = vld [vmem:[#allocation5 + $0x3c0] sm:$0xff]  ;;  %s733_s0 = smov [#allocation7]   ;;  %s635_s23 = sshll.u32 %s780_s2, 4  ;;  %s636_s23 = int_to_ptr.hbm [resolvable:$true] %s635_s23 }
   0xc   :  { %v293_v1 = vld [vmem:[#allocation5 + $0x7c8] sm:$0xff]  ;;  %340 = vmatpush.msra.mxu2 %v165_v0  ;;  %v292_v7 = vld [vmem:[#allocation5 + $0x7c0] sm:$0xff]  ;;  %300 = vmatpush.msra.mxu0 %v164_v6  ;;  %v167_v60 = vld [vmem:[#allocation5 + $0x3d8] sm:$0xff]  ;;  %s633_s1 = sshll.u32 %s733_s0, 4  ;;  %s634_s1 = int_to_ptr.vmem [resolvable:$true] %s633_s1 }
   0xd   :  { %v157_v2 = vld [vmem:[#allocation5 + $0x388] sm:$0xff]  ;;  %360 = vmatpush.msra.mxu3 %v293_v1  ;;  %v156_v8 = vld [vmem:[#allocation5 + $0x380] sm:$0xff]  ;;  %320 = vmatpush.msra.mxu1 %v292_v7  ;;  %v295_v61 = vld [vmem:[#allocation5 + $0x7d8] sm:$0xff] }
   0xe   :  { %v285_v3 = vld [vmem:[#allocation5 + $0x788] sm:$0xff]  ;;  %341 = vmatpush.msra.mxu2 %v157_v2  ;;  %v284_v9 = vld [vmem:[#allocation5 + $0x780] sm:$0xff]  ;;  %301 = vmatpush.msra.mxu0 %v156_v8  ;;  %v159_v0 = vld [vmem:[#allocation5 + $0x398] sm:$0xff] }
   0xf   :  { %v149_v4 = vld [vmem:[#allocation5 + $0x348] sm:$0xff]  ;;  %361 = vmatpush.msra.mxu3 %v285_v3  ;;  %v148_v12 = vld [vmem:[#allocation5 + $0x340] sm:$0xff]  ;;  %321 = vmatpush.msra.mxu1 %v284_v9  ;;  %v287_v1 = vld [vmem:[#allocation5 + $0x798] sm:$0xff] }
  0x10   :  { %v277_v5 = vld [vmem:[#allocation5 + $0x748] sm:$0xff]  ;;  %342 = vmatpush.msra.mxu2 %v149_v4  ;;  %v276_v13 = vld [vmem:[#allocation5 + $0x740] sm:$0xff]  ;;  %302 = vmatpush.msra.mxu0 %v148_v12  ;;  %v151_v4 = vld [vmem:[#allocation5 + $0x358] sm:$0xff] }
  0x11   :  { %v141_v10 = vld [vmem:[#allocation5 + $0x308] sm:$0xff]  ;;  %362 = vmatpush.msra.mxu3 %v277_v5  ;;  %v140_v16 = vld [vmem:[#allocation5 + $0x300] sm:$0xff]  ;;  %322 = vmatpush.msra.mxu1 %v276_v13  ;;  %v279_v5 = vld [vmem:[#allocation5 + $0x758] sm:$0xff] }
  0x12   :  { %v269_v11 = vld [vmem:[#allocation5 + $0x708] sm:$0xff]  ;;  %343 = vmatpush.msra.mxu2 %v141_v10  ;;  %v268_v17 = vld [vmem:[#allocation5 + $0x700] sm:$0xff]  ;;  %303 = vmatpush.msra.mxu0 %v140_v16  ;;  %v166_v6 = vld [vmem:[#allocation5 + $0x3d0] sm:$0xff] }
  0x13   :  { %v133_v14 = vld [vmem:[#allocation5 + $0x2c8] sm:$0xff]  ;;  %363 = vmatpush.msra.mxu3 %v269_v11  ;;  %v132_v20 = vld [vmem:[#allocation5 + $0x2c0] sm:$0xff]  ;;  %323 = vmatpush.msra.mxu1 %v268_v17  ;;  %v294_v7 = vld [vmem:[#allocation5 + $0x7d0] sm:$0xff] }
  0x14   :  { %v261_v15 = vld [vmem:[#allocation5 + $0x6c8] sm:$0xff]  ;;  %344 = vmatpush.msra.mxu2 %v133_v14  ;;  %v260_v21 = vld [vmem:[#allocation5 + $0x6c0] sm:$0xff]  ;;  %304 = vmatpush.msra.mxu0 %v132_v20  ;;  %v143_v8 = vld [vmem:[#allocation5 + $0x318] sm:$0xff] }
  0x15   :  { %v125_v18 = vld [vmem:[#allocation5 + $0x288] sm:$0xff]  ;;  %364 = vmatpush.msra.mxu3 %v261_v15  ;;  %v124_v24 = vld [vmem:[#allocation5 + $0x280] sm:$0xff]  ;;  %324 = vmatpush.msra.mxu1 %v260_v21  ;;  %v271_v9 = vld [vmem:[#allocation5 + $0x718] sm:$0xff] }
  0x16   :  { %v253_v19 = vld [vmem:[#allocation5 + $0x688] sm:$0xff]  ;;  %345 = vmatpush.msra.mxu2 %v125_v18  ;;  %v252_v25 = vld [vmem:[#allocation5 + $0x680] sm:$0xff]  ;;  %305 = vmatpush.msra.mxu0 %v124_v24  ;;  %v158_v10 = vld [vmem:[#allocation5 + $0x390] sm:$0xff] }
  0x17   :  { %v117_v22 = vld [vmem:[#allocation5 + $0x248] sm:$0xff]  ;;  %365 = vmatpush.msra.mxu3 %v253_v19  ;;  %v116_v28 = vld [vmem:[#allocation5 + $0x240] sm:$0xff]  ;;  %325 = vmatpush.msra.mxu1 %v252_v25  ;;  %v286_v11 = vld [vmem:[#allocation5 + $0x790] sm:$0xff] }
  0x18   :  { %v245_v23 = vld [vmem:[#allocation5 + $0x648] sm:$0xff]  ;;  %346 = vmatpush.msra.mxu2 %v117_v22  ;;  %v244_v29 = vld [vmem:[#allocation5 + $0x640] sm:$0xff]  ;;  %306 = vmatpush.msra.mxu0 %v116_v28  ;;  %v135_v12 = vld [vmem:[#allocation5 + $0x2d8] sm:$0xff] }
  0x19   :  { %v109_v26 = vld [vmem:[#allocation5 + $0x208] sm:$0xff]  ;;  %366 = vmatpush.msra.mxu3 %v245_v23  ;;  %v108_v32 = vld [vmem:[#allocation5 + $0x200] sm:$0xff]  ;;  %326 = vmatpush.msra.mxu1 %v244_v29  ;;  %v263_v13 = vld [vmem:[#allocation5 + $0x6d8] sm:$0xff] }
  0x1a   :  { %v237_v27 = vld [vmem:[#allocation5 + $0x608] sm:$0xff]  ;;  %347 = vmatpush.msra.mxu2 %v109_v26  ;;  %v236_v33 = vld [vmem:[#allocation5 + $0x600] sm:$0xff]  ;;  %307 = vmatpush.msra.mxu0 %v108_v32  ;;  %v150_v14 = vld [vmem:[#allocation5 + $0x350] sm:$0xff] }
  0x1b   :  { %v101_v30 = vld [vmem:[#allocation5 + $0x1c8] sm:$0xff]  ;;  %367 = vmatpush.msra.mxu3 %v237_v27  ;;  %v100_v36 = vld [vmem:[#allocation5 + $0x1c0] sm:$0xff]  ;;  %327 = vmatpush.msra.mxu1 %v236_v33  ;;  %v278_v15 = vld [vmem:[#allocation5 + $0x750] sm:$0xff] }
  0x1c   :  { %v229_v31 = vld [vmem:[#allocation5 + $0x5c8] sm:$0xff]  ;;  %348 = vmatpush.msra.mxu2 %v101_v30  ;;  %v228_v37 = vld [vmem:[#allocation5 + $0x5c0] sm:$0xff]  ;;  %308 = vmatpush.msra.mxu0 %v100_v36  ;;  %v127_v16 = vld [vmem:[#allocation5 + $0x298] sm:$0xff] }
  0x1d   :  { %v93_v34 = vld [vmem:[#allocation5 + $0x188] sm:$0xff]  ;;  %368 = vmatpush.msra.mxu3 %v229_v31  ;;  %v92_v40 = vld [vmem:[#allocation5 + $0x180] sm:$0xff]  ;;  %328 = vmatpush.msra.mxu1 %v228_v37  ;;  %v255_v17 = vld [vmem:[#allocation5 + $0x698] sm:$0xff] }
  0x1e   :  { %v221_v35 = vld [vmem:[#allocation5 + $0x588] sm:$0xff]  ;;  %349 = vmatpush.msra.mxu2 %v93_v34  ;;  %v220_v41 = vld [vmem:[#allocation5 + $0x580] sm:$0xff]  ;;  %309 = vmatpush.msra.mxu0 %v92_v40  ;;  %v142_v18 = vld [vmem:[#allocation5 + $0x310] sm:$0xff] }
  0x1f   :  { %v85_v38 = vld [vmem:[#allocation5 + $0x148] sm:$0xff]  ;;  %369 = vmatpush.msra.mxu3 %v221_v35  ;;  %v84_v44 = vld [vmem:[#allocation5 + $0x140] sm:$0xff]  ;;  %329 = vmatpush.msra.mxu1 %v220_v41  ;;  %v270_v19 = vld [vmem:[#allocation5 + $0x710] sm:$0xff] }
  0x20   :  { %v213_v39 = vld [vmem:[#allocation5 + $0x548] sm:$0xff]  ;;  %350 = vmatpush.msra.mxu2 %v85_v38  ;;  %v212_v45 = vld [vmem:[#allocation5 + $0x540] sm:$0xff]  ;;  %310 = vmatpush.msra.mxu0 %v84_v44  ;;  %v119_v20 = vld [vmem:[#allocation5 + $0x258] sm:$0xff] }
  0x21   :  { %v77_v42 = vld [vmem:[#allocation5 + $0x108] sm:$0xff]  ;;  %370 = vmatpush.msra.mxu3 %v213_v39  ;;  %v76_v48 = vld [vmem:[#allocation5 + $0x100] sm:$0xff]  ;;  %330 = vmatpush.msra.mxu1 %v212_v45  ;;  %v247_v21 = vld [vmem:[#allocation5 + $0x658] sm:$0xff] }
  0x22   :  { %v205_v43 = vld [vmem:[#allocation5 + $0x508] sm:$0xff]  ;;  %351 = vmatpush.msra.mxu2 %v77_v42  ;;  %v204_v49 = vld [vmem:[#allocation5 + $0x500] sm:$0xff]  ;;  %311 = vmatpush.msra.mxu0 %v76_v48  ;;  %v134_v22 = vld [vmem:[#allocation5 + $0x2d0] sm:$0xff] }
  0x23   :  { %v69_v46 = vld [vmem:[#allocation5 + $0xc8] sm:$0xff]  ;;  %371 = vmatpush.msra.mxu3 %v205_v43  ;;  %v68_v52 = vld [vmem:[#allocation5 + $0xc0] sm:$0xff]  ;;  %331 = vmatpush.msra.mxu1 %v204_v49  ;;  %v262_v23 = vld [vmem:[#allocation5 + $0x6d0] sm:$0xff] }
  0x24   :  { %v197_v47 = vld [vmem:[#allocation5 + $0x4c8] sm:$0xff]  ;;  %352 = vmatpush.msra.mxu2 %v69_v46  ;;  %v196_v53 = vld [vmem:[#allocation5 + $0x4c0] sm:$0xff]  ;;  %312 = vmatpush.msra.mxu0 %v68_v52  ;;  %v111_v24 = vld [vmem:[#allocation5 + $0x218] sm:$0xff] }
  0x25   :  { %v61_v50 = vld [vmem:[#allocation5 + $0x88] sm:$0xff]  ;;  %372 = vmatpush.msra.mxu3 %v197_v47  ;;  %v60_v56 = vld [vmem:[#allocation5 + $0x80] sm:$0xff]  ;;  %332 = vmatpush.msra.mxu1 %v196_v53  ;;  %v239_v25 = vld [vmem:[#allocation5 + $0x618] sm:$0xff] }
  0x26   :  { %v189_v51 = vld [vmem:[#allocation5 + $0x488] sm:$0xff]  ;;  %353 = vmatpush.msra.mxu2 %v61_v50  ;;  %v188_v57 = vld [vmem:[#allocation5 + $0x480] sm:$0xff]  ;;  %313 = vmatpush.msra.mxu0 %v60_v56  ;;  %v126_v26 = vld [vmem:[#allocation5 + $0x290] sm:$0xff] }
  0x27   :  { %v53_v54 = vld [vmem:[#allocation5 + $0x48] sm:$0xff]  ;;  %373 = vmatpush.msra.mxu3 %v189_v51  ;;  %333 = vmatpush.msra.mxu1 %v188_v57  ;;  %v52_v62 = vld [vmem:[#allocation5 + $0x40] sm:$0xff]  ;;  %v254_v27 = vld [vmem:[#allocation5 + $0x690] sm:$0xff] }
  0x28   :  { %v181_v55 = vld [vmem:[#allocation5 + $0x448] sm:$0xff]  ;;  %354 = vmatpush.msra.mxu2 %v53_v54  ;;  %v180_v63 = vld [vmem:[#allocation5 + $0x440] sm:$0xff]  ;;  %314 = vmatpush.msra.mxu0 %v52_v62  ;;  %v103_v28 = vld [vmem:[#allocation5 + $0x1d8] sm:$0xff] }
  0x29   :  { %v45_v58 = vld [vmem:[#allocation5 + $0x8] sm:$0xff]  ;;  %374 = vmatpush.msra.mxu3 %v181_v55  ;;  %v44_v2 = vld [vmem:[#allocation5] sm:$0xff]  ;;  %334 = vmatpush.msra.mxu1 %v180_v63  ;;  %v231_v29 = vld [vmem:[#allocation5 + $0x5d8] sm:$0xff] }
  0x2a   :  { %v173_v59 = vld [vmem:[#allocation5 + $0x408] sm:$0xff]  ;;  %355 = vmatpush.msra.mxu2 %v45_v58  ;;  %v172_v3 = vld [vmem:[#allocation5 + $0x400] sm:$0xff]  ;;  %315 = vmatpush.msra.mxu0 %v44_v2  ;;  %v118_v30 = vld [vmem:[#allocation5 + $0x250] sm:$0xff] }
  0x2b   :  { %375 = vmatpush.msra.mxu3 %v173_v59  ;;  %335 = vmatpush.msra.mxu1 %v172_v3  ;;  %v246_v31 = vld [vmem:[#allocation5 + $0x650] sm:$0xff]  ;;  %v95_v32 = vld [vmem:[#allocation5 + $0x198] sm:$0xff] }
  0x2c   :  { %420 = vmatpush.msrb.mxu2 %v167_v60  ;;  %380 = vmatpush.msrb.mxu0 %v166_v6  ;;  %v223_v33 = vld [vmem:[#allocation5 + $0x598] sm:$0xff]  ;;  %v110_v34 = vld [vmem:[#allocation5 + $0x210] sm:$0xff]  ;;  %v169_v60 = vld [vmem:[#allocation5 + $0x3e8] sm:$0xff] }
  0x2d   :  { %440 = vmatpush.msrb.mxu3 %v295_v61  ;;  %400 = vmatpush.msrb.mxu1 %v294_v7  ;;  %v238_v35 = vld [vmem:[#allocation5 + $0x610] sm:$0xff]  ;;  %v87_v36 = vld [vmem:[#allocation5 + $0x158] sm:$0xff]  ;;  %v297_v61 = vld [vmem:[#allocation5 + $0x7e8] sm:$0xff] }
  0x2e   :  { %421 = vmatpush.msrb.mxu2 %v159_v0  ;;  %381 = vmatpush.msrb.mxu0 %v158_v10  ;;  %v215_v37 = vld [vmem:[#allocation5 + $0x558] sm:$0xff]  ;;  %v102_v38 = vld [vmem:[#allocation5 + $0x1d0] sm:$0xff]  ;;  %v161_v0 = vld [vmem:[#allocation5 + $0x3a8] sm:$0xff] }
  0x2f   :  { %441 = vmatpush.msrb.mxu3 %v287_v1  ;;  %401 = vmatpush.msrb.mxu1 %v286_v11  ;;  %v230_v39 = vld [vmem:[#allocation5 + $0x5d0] sm:$0xff]  ;;  %v79_v40 = vld [vmem:[#allocation5 + $0x118] sm:$0xff]  ;;  %v289_v1 = vld [vmem:[#allocation5 + $0x7a8] sm:$0xff] }
  0x30   :  { %422 = vmatpush.msrb.mxu2 %v151_v4  ;;  %382 = vmatpush.msrb.mxu0 %v150_v14  ;;  %v207_v41 = vld [vmem:[#allocation5 + $0x518] sm:$0xff]  ;;  %v94_v42 = vld [vmem:[#allocation5 + $0x190] sm:$0xff]  ;;  %v153_v4 = vld [vmem:[#allocation5 + $0x368] sm:$0xff] }
  0x31   :  { %442 = vmatpush.msrb.mxu3 %v279_v5  ;;  %402 = vmatpush.msrb.mxu1 %v278_v15  ;;  %v222_v43 = vld [vmem:[#allocation5 + $0x590] sm:$0xff]  ;;  %v71_v44 = vld [vmem:[#allocation5 + $0xd8] sm:$0xff]  ;;  %v281_v5 = vld [vmem:[#allocation5 + $0x768] sm:$0xff] }
  0x32   :  { %423 = vmatpush.msrb.mxu2 %v143_v8  ;;  %383 = vmatpush.msrb.mxu0 %v142_v18  ;;  %v199_v45 = vld [vmem:[#allocation5 + $0x4d8] sm:$0xff]  ;;  %v86_v46 = vld [vmem:[#allocation5 + $0x150] sm:$0xff]  ;;  %v168_v8 = vld [vmem:[#allocation5 + $0x3e0] sm:$0xff] }
  0x33   :  { %443 = vmatpush.msrb.mxu3 %v271_v9  ;;  %403 = vmatpush.msrb.mxu1 %v270_v19  ;;  %v214_v47 = vld [vmem:[#allocation5 + $0x550] sm:$0xff]  ;;  %v63_v48 = vld [vmem:[#allocation5 + $0x98] sm:$0xff]  ;;  %v296_v9 = vld [vmem:[#allocation5 + $0x7e0] sm:$0xff] }
  0x34   :  { %424 = vmatpush.msrb.mxu2 %v135_v12  ;;  %384 = vmatpush.msrb.mxu0 %v134_v22  ;;  %v191_v49 = vld [vmem:[#allocation5 + $0x498] sm:$0xff]  ;;  %v78_v50 = vld [vmem:[#allocation5 + $0x110] sm:$0xff]  ;;  %v145_v10 = vld [vmem:[#allocation5 + $0x328] sm:$0xff] }
  0x35   :  { %444 = vmatpush.msrb.mxu3 %v263_v13  ;;  %404 = vmatpush.msrb.mxu1 %v262_v23  ;;  %v206_v51 = vld [vmem:[#allocation5 + $0x510] sm:$0xff]  ;;  %v55_v52 = vld [vmem:[#allocation5 + $0x58] sm:$0xff]  ;;  %v273_v11 = vld [vmem:[#allocation5 + $0x728] sm:$0xff] }
  0x36   :  { %425 = vmatpush.msrb.mxu2 %v127_v16  ;;  %385 = vmatpush.msrb.mxu0 %v126_v26  ;;  %v183_v53 = vld [vmem:[#allocation5 + $0x458] sm:$0xff]  ;;  %v70_v54 = vld [vmem:[#allocation5 + $0xd0] sm:$0xff]  ;;  %v160_v12 = vld [vmem:[#allocation5 + $0x3a0] sm:$0xff] }
  0x37   :  { %445 = vmatpush.msrb.mxu3 %v255_v17  ;;  %405 = vmatpush.msrb.mxu1 %v254_v27  ;;  %v198_v55 = vld [vmem:[#allocation5 + $0x4d0] sm:$0xff]  ;;  %v47_v56 = vld [vmem:[#allocation5 + $0x18] sm:$0xff]  ;;  %v288_v13 = vld [vmem:[#allocation5 + $0x7a0] sm:$0xff] }
  0x38   :  { %426 = vmatpush.msrb.mxu2 %v119_v20  ;;  %386 = vmatpush.msrb.mxu0 %v118_v30  ;;  %v175_v57 = vld [vmem:[#allocation5 + $0x418] sm:$0xff]  ;;  %v755_v58 = vld [vmem:[#allocation2] sm:$0xff]  ;;  %v137_v14 = vld [vmem:[#allocation5 + $0x2e8] sm:$0xff] }
  0x39   :  { %446 = vmatpush.msrb.mxu3 %v247_v21  ;;  %406 = vmatpush.msrb.mxu1 %v246_v31  ;;  %v757_v59 = vld [vmem:[#allocation2 + $0x8] sm:$0xff]  ;;  %v62_v62 = vld [vmem:[#allocation5 + $0x90] sm:$0xff]  ;;  %v265_v15 = vld [vmem:[#allocation5 + $0x6e8] sm:$0xff] }
  0x3a   :  { %427 = vmatpush.msrb.mxu2 %v111_v24  ;;  %387 = vmatpush.msrb.mxu0 %v110_v34  ;;  %v190_v63 = vld [vmem:[#allocation5 + $0x490] sm:$0xff]  ;;  %v152_v16 = vld [vmem:[#allocation5 + $0x360] sm:$0xff]  ;;  %v129_v18 = vld [vmem:[#allocation5 + $0x2a8] sm:$0xff] }
  0x3b   :  { %447 = vmatpush.msrb.mxu3 %v239_v25  ;;  %407 = vmatpush.msrb.mxu1 %v238_v35  ;;  %v54_v2 = vld [vmem:[#allocation5 + $0x50] sm:$0xff]  ;;  %v280_v17 = vld [vmem:[#allocation5 + $0x760] sm:$0xff]  ;;  %v257_v19 = vld [vmem:[#allocation5 + $0x6a8] sm:$0xff] }
  0x3c   :  { %428 = vmatpush.msrb.mxu2 %v103_v28  ;;  %388 = vmatpush.msrb.mxu0 %v102_v38  ;;  %v182_v3 = vld [vmem:[#allocation5 + $0x450] sm:$0xff]  ;;  %v144_v20 = vld [vmem:[#allocation5 + $0x320] sm:$0xff]  ;;  %v121_v22 = vld [vmem:[#allocation5 + $0x268] sm:$0xff] }
  0x3d   :  { %448 = vmatpush.msrb.mxu3 %v231_v29  ;;  %408 = vmatpush.msrb.mxu1 %v230_v39  ;;  %v46_v6 = vld [vmem:[#allocation5 + $0x10] sm:$0xff]  ;;  %v272_v21 = vld [vmem:[#allocation5 + $0x720] sm:$0xff]  ;;  %v249_v23 = vld [vmem:[#allocation5 + $0x668] sm:$0xff] }
  0x3e   :  { %429 = vmatpush.msrb.mxu2 %v95_v32  ;;  %389 = vmatpush.msrb.mxu0 %v94_v42  ;;  %v174_v7 = vld [vmem:[#allocation5 + $0x410] sm:$0xff]  ;;  %v136_v24 = vld [vmem:[#allocation5 + $0x2e0] sm:$0xff]  ;;  %v113_v26 = vld [vmem:[#allocation5 + $0x228] sm:$0xff] }
  0x3f   :  { %449 = vmatpush.msrb.mxu3 %v223_v33  ;;  %409 = vmatpush.msrb.mxu1 %v222_v43  ;;  %v264_v25 = vld [vmem:[#allocation5 + $0x6e0] sm:$0xff]  ;;  %v241_v27 = vld [vmem:[#allocation5 + $0x628] sm:$0xff] }
  0x40   :  { %430 = vmatpush.msrb.mxu2 %v87_v36  ;;  %390 = vmatpush.msrb.mxu0 %v86_v46  ;;  %v128_v28 = vld [vmem:[#allocation5 + $0x2a0] sm:$0xff]  ;;  %v105_v30 = vld [vmem:[#allocation5 + $0x1e8] sm:$0xff] }
  0x41   :  { %450 = vmatpush.msrb.mxu3 %v215_v37  ;;  %410 = vmatpush.msrb.mxu1 %v214_v47  ;;  %v256_v29 = vld [vmem:[#allocation5 + $0x6a0] sm:$0xff]  ;;  %v233_v31 = vld [vmem:[#allocation5 + $0x5e8] sm:$0xff] }
  0x42   :  { %431 = vmatpush.msrb.mxu2 %v79_v40  ;;  %391 = vmatpush.msrb.mxu0 %v78_v50  ;;  %v120_v32 = vld [vmem:[#allocation5 + $0x260] sm:$0xff]  ;;  %v97_v34 = vld [vmem:[#allocation5 + $0x1a8] sm:$0xff] }
  0x43   :  { %451 = vmatpush.msrb.mxu3 %v207_v41  ;;  %411 = vmatpush.msrb.mxu1 %v206_v51  ;;  %v248_v33 = vld [vmem:[#allocation5 + $0x660] sm:$0xff]  ;;  %v225_v35 = vld [vmem:[#allocation5 + $0x5a8] sm:$0xff] }
  0x44   :  { %432 = vmatpush.msrb.mxu2 %v71_v44  ;;  %392 = vmatpush.msrb.mxu0 %v70_v54  ;;  %v112_v36 = vld [vmem:[#allocation5 + $0x220] sm:$0xff]  ;;  %v89_v38 = vld [vmem:[#allocation5 + $0x168] sm:$0xff] }
  0x45   :  { %452 = vmatpush.msrb.mxu3 %v199_v45  ;;  %412 = vmatpush.msrb.mxu1 %v198_v55  ;;  %v240_v37 = vld [vmem:[#allocation5 + $0x620] sm:$0xff]  ;;  %v217_v39 = vld [vmem:[#allocation5 + $0x568] sm:$0xff] }
  0x46   :  { %433 = vmatpush.msrb.mxu2 %v63_v48  ;;  %376 = vmatmul.f32.vlgmr.msra.gmra.mxu3 %v757_v59  ;;  %v104_v40 = vld [vmem:[#allocation5 + $0x1e0] sm:$0xff]  ;;  %v81_v42 = vld [vmem:[#allocation5 + $0x128] sm:$0xff] }
  0x47   :  { %453 = vmatpush.msrb.mxu3 %v191_v49  ;;  %356 = vmatmul.f32.vlgmr.msra.gmra.mxu2 %v755_v58  ;;  %v232_v41 = vld [vmem:[#allocation5 + $0x5e0] sm:$0xff]  ;;  %v209_v43 = vld [vmem:[#allocation5 + $0x528] sm:$0xff] }
  0x48   :  { %434 = vmatpush.msrb.mxu2 %v55_v52  ;;  %393 = vmatpush.msrb.mxu0 %v62_v62  ;;  %v96_v44 = vld [vmem:[#allocation5 + $0x1a0] sm:$0xff]  ;;  %v73_v46 = vld [vmem:[#allocation5 + $0xe8] sm:$0xff]  ;;  %v171_v62 = vld [vmem:[#allocation5 + $0x3f8] sm:$0xff] }
  0x49   :  { %454 = vmatpush.msrb.mxu3 %v183_v53  ;;  %413 = vmatpush.msrb.mxu1 %v190_v63  ;;  %v224_v45 = vld [vmem:[#allocation5 + $0x5a0] sm:$0xff]  ;;  %v201_v47 = vld [vmem:[#allocation5 + $0x4e8] sm:$0xff]  ;;  %v299_v63 = vld [vmem:[#allocation5 + $0x7f8] sm:$0xff] }
  0x4a   :  { %435 = vmatpush.msrb.mxu2 %v47_v56  ;;  %394 = vmatpush.msrb.mxu0 %v54_v2  ;;  %v88_v48 = vld [vmem:[#allocation5 + $0x160] sm:$0xff]  ;;  %v65_v50 = vld [vmem:[#allocation5 + $0xa8] sm:$0xff]  ;;  %v163_v2 = vld [vmem:[#allocation5 + $0x3b8] sm:$0xff] }
  0x4b   :  { %455 = vmatpush.msrb.mxu3 %v175_v57  ;;  %414 = vmatpush.msrb.mxu1 %v182_v3  ;;  %v216_v49 = vld [vmem:[#allocation5 + $0x560] sm:$0xff]  ;;  %v193_v51 = vld [vmem:[#allocation5 + $0x4a8] sm:$0xff]  ;;  %v291_v3 = vld [vmem:[#allocation5 + $0x7b8] sm:$0xff] }
  0x4c   :  { %500 = vmatpush.msra.mxu2 %v169_v60  ;;  %395 = vmatpush.msrb.mxu0 %v46_v6  ;;  %v80_v52 = vld [vmem:[#allocation5 + $0x120] sm:$0xff]  ;;  %v57_v54 = vld [vmem:[#allocation5 + $0x68] sm:$0xff]  ;;  %v155_v6 = vld [vmem:[#allocation5 + $0x378] sm:$0xff] }
  0x4d   :  { %520 = vmatpush.msra.mxu3 %v297_v61  ;;  %415 = vmatpush.msrb.mxu1 %v174_v7  ;;  %v208_v53 = vld [vmem:[#allocation5 + $0x520] sm:$0xff]  ;;  %v185_v55 = vld [vmem:[#allocation5 + $0x468] sm:$0xff]  ;;  %v283_v7 = vld [vmem:[#allocation5 + $0x778] sm:$0xff] }
  0x4e   :  { %501 = vmatpush.msra.mxu2 %v161_v0  ;;  %316 = vmatmul.f32.vlgmr.msra.gmra.mxu0 %v755_v58  ;;  %v72_v56 = vld [vmem:[#allocation5 + $0xe0] sm:$0xff]  ;;  %v49_v60 = vld [vmem:[#allocation5 + $0x28] sm:$0xff] }
  0x4f   :  { %521 = vmatpush.msra.mxu3 %v289_v1  ;;  %336 = vmatmul.f32.vlgmr.msra.gmra.mxu1 %v757_v59  ;;  %v200_v57 = vld [vmem:[#allocation5 + $0x4e0] sm:$0xff]  ;;  %v177_v61 = vld [vmem:[#allocation5 + $0x428] sm:$0xff] }
  0x50   :  { %502 = vmatpush.msra.mxu2 %v153_v4  ;;  %460 = vmatpush.msra.mxu0 %v168_v8  ;;  %v64_v0 = vld [vmem:[#allocation5 + $0xa0] sm:$0xff] }
  0x51   :  { %522 = vmatpush.msra.mxu3 %v281_v5  ;;  %480 = vmatpush.msra.mxu1 %v296_v9  ;;  %v192_v1 = vld [vmem:[#allocation5 + $0x4a0] sm:$0xff] }
  0x52   :  { %503 = vmatpush.msra.mxu2 %v145_v10  ;;  %461 = vmatpush.msra.mxu0 %v160_v12  ;;  %v56_v4 = vld [vmem:[#allocation5 + $0x60] sm:$0xff]  ;;  %v170_v10 = vld [vmem:[#allocation5 + $0x3f0] sm:$0xff]  ;;  %v147_v12 = vld [vmem:[#allocation5 + $0x338] sm:$0xff] }
  0x53   :  { %523 = vmatpush.msra.mxu3 %v273_v11  ;;  %481 = vmatpush.msra.mxu1 %v288_v13  ;;  %v184_v5 = vld [vmem:[#allocation5 + $0x460] sm:$0xff]  ;;  %v298_v11 = vld [vmem:[#allocation5 + $0x7f0] sm:$0xff]  ;;  %v275_v13 = vld [vmem:[#allocation5 + $0x738] sm:$0xff] }
  0x54   :  { %504 = vmatpush.msra.mxu2 %v137_v14  ;;  %462 = vmatpush.msra.mxu0 %v152_v16  ;;  %v48_v8 = vld [vmem:[#allocation5 + $0x20] sm:$0xff]  ;;  %v162_v14 = vld [vmem:[#allocation5 + $0x3b0] sm:$0xff]  ;;  %v139_v16 = vld [vmem:[#allocation5 + $0x2f8] sm:$0xff] }
  0x55   :  { %524 = vmatpush.msra.mxu3 %v265_v15  ;;  %482 = vmatpush.msra.mxu1 %v280_v17  ;;  %v176_v9 = vld [vmem:[#allocation5 + $0x420] sm:$0xff]  ;;  %v290_v15 = vld [vmem:[#allocation5 + $0x7b0] sm:$0xff]  ;;  %v267_v17 = vld [vmem:[#allocation5 + $0x6f8] sm:$0xff] }
  0x56   :  { %505 = vmatpush.msra.mxu2 %v129_v18  ;;  %463 = vmatpush.msra.mxu0 %v144_v20  ;;  %v154_v18 = vld [vmem:[#allocation5 + $0x370] sm:$0xff]  ;;  %v131_v20 = vld [vmem:[#allocation5 + $0x2b8] sm:$0xff] }
  0x57   :  { %525 = vmatpush.msra.mxu3 %v257_v19  ;;  %483 = vmatpush.msra.mxu1 %v272_v21  ;;  %v282_v19 = vld [vmem:[#allocation5 + $0x770] sm:$0xff]  ;;  %v259_v21 = vld [vmem:[#allocation5 + $0x6b8] sm:$0xff] }
  0x58   :  { %506 = vmatpush.msra.mxu2 %v121_v22  ;;  %464 = vmatpush.msra.mxu0 %v136_v24  ;;  %v146_v22 = vld [vmem:[#allocation5 + $0x330] sm:$0xff]  ;;  %v123_v24 = vld [vmem:[#allocation5 + $0x278] sm:$0xff] }
  0x59   :  { %526 = vmatpush.msra.mxu3 %v249_v23  ;;  %484 = vmatpush.msra.mxu1 %v264_v25  ;;  %v274_v23 = vld [vmem:[#allocation5 + $0x730] sm:$0xff]  ;;  %v251_v25 = vld [vmem:[#allocation5 + $0x678] sm:$0xff] }
  0x5a   :  { %507 = vmatpush.msra.mxu2 %v113_v26  ;;  %465 = vmatpush.msra.mxu0 %v128_v28  ;;  %v138_v26 = vld [vmem:[#allocation5 + $0x2f0] sm:$0xff]  ;;  %v115_v28 = vld [vmem:[#allocation5 + $0x238] sm:$0xff] }
  0x5b   :  { %527 = vmatpush.msra.mxu3 %v241_v27  ;;  %485 = vmatpush.msra.mxu1 %v256_v29  ;;  %v266_v27 = vld [vmem:[#allocation5 + $0x6f0] sm:$0xff]  ;;  %v243_v29 = vld [vmem:[#allocation5 + $0x638] sm:$0xff] }
  0x5c   :  { %508 = vmatpush.msra.mxu2 %v105_v30  ;;  %466 = vmatpush.msra.mxu0 %v120_v32  ;;  %v130_v30 = vld [vmem:[#allocation5 + $0x2b0] sm:$0xff]  ;;  %v107_v32 = vld [vmem:[#allocation5 + $0x1f8] sm:$0xff] }
  0x5d   :  { %528 = vmatpush.msra.mxu3 %v233_v31  ;;  %486 = vmatpush.msra.mxu1 %v248_v33  ;;  %v258_v31 = vld [vmem:[#allocation5 + $0x6b0] sm:$0xff]  ;;  %v235_v33 = vld [vmem:[#allocation5 + $0x5f8] sm:$0xff] }
  0x5e   :  { %509 = vmatpush.msra.mxu2 %v97_v34  ;;  %467 = vmatpush.msra.mxu0 %v112_v36  ;;  %v122_v34 = vld [vmem:[#allocation5 + $0x270] sm:$0xff]  ;;  %v99_v36 = vld [vmem:[#allocation5 + $0x1b8] sm:$0xff] }
  0x5f   :  { %529 = vmatpush.msra.mxu3 %v225_v35  ;;  %487 = vmatpush.msra.mxu1 %v240_v37  ;;  %v250_v35 = vld [vmem:[#allocation5 + $0x670] sm:$0xff]  ;;  %v227_v37 = vld [vmem:[#allocation5 + $0x5b8] sm:$0xff] }
  0x60   :  { %510 = vmatpush.msra.mxu2 %v89_v38  ;;  %468 = vmatpush.msra.mxu0 %v104_v40  ;;  %v114_v38 = vld [vmem:[#allocation5 + $0x230] sm:$0xff]  ;;  %v91_v40 = vld [vmem:[#allocation5 + $0x178] sm:$0xff] }
  0x61   :  { %530 = vmatpush.msra.mxu3 %v217_v39  ;;  %488 = vmatpush.msra.mxu1 %v232_v41  ;;  %v242_v39 = vld [vmem:[#allocation5 + $0x630] sm:$0xff]  ;;  %v219_v41 = vld [vmem:[#allocation5 + $0x578] sm:$0xff] }
  0x62   :  { %511 = vmatpush.msra.mxu2 %v81_v42  ;;  %469 = vmatpush.msra.mxu0 %v96_v44  ;;  %v106_v42 = vld [vmem:[#allocation5 + $0x1f0] sm:$0xff]  ;;  %v83_v44 = vld [vmem:[#allocation5 + $0x138] sm:$0xff] }
  0x63   :  { %531 = vmatpush.msra.mxu3 %v209_v43  ;;  %489 = vmatpush.msra.mxu1 %v224_v45  ;;  %v234_v43 = vld [vmem:[#allocation5 + $0x5f0] sm:$0xff]  ;;  %v211_v45 = vld [vmem:[#allocation5 + $0x538] sm:$0xff] }
  0x64   :  { %512 = vmatpush.msra.mxu2 %v73_v46  ;;  %470 = vmatpush.msra.mxu0 %v88_v48  ;;  %v98_v46 = vld [vmem:[#allocation5 + $0x1b0] sm:$0xff]  ;;  %v75_v48 = vld [vmem:[#allocation5 + $0xf8] sm:$0xff] }
  0x65   :  { %532 = vmatpush.msra.mxu3 %v201_v47  ;;  %490 = vmatpush.msra.mxu1 %v216_v49  ;;  %v226_v47 = vld [vmem:[#allocation5 + $0x5b0] sm:$0xff]  ;;  %v203_v49 = vld [vmem:[#allocation5 + $0x4f8] sm:$0xff] }
  0x66   :  { %513 = vmatpush.msra.mxu2 %v65_v50  ;;  %471 = vmatpush.msra.mxu0 %v80_v52  ;;  %v90_v50 = vld [vmem:[#allocation5 + $0x170] sm:$0xff]  ;;  %v67_v52 = vld [vmem:[#allocation5 + $0xb8] sm:$0xff] }
  0x67   :  { %533 = vmatpush.msra.mxu3 %v193_v51  ;;  %491 = vmatpush.msra.mxu1 %v208_v53  ;;  %v218_v51 = vld [vmem:[#allocation5 + $0x570] sm:$0xff]  ;;  %v195_v53 = vld [vmem:[#allocation5 + $0x4b8] sm:$0xff] }
  0x68   :  { %514 = vmatpush.msra.mxu2 %v57_v54  ;;  %472 = vmatpush.msra.mxu0 %v72_v56  ;;  %v82_v54 = vld [vmem:[#allocation5 + $0x130] sm:$0xff]  ;;  %v59_v56 = vld [vmem:[#allocation5 + $0x78] sm:$0xff] }
  0x69   :  { %534 = vmatpush.msra.mxu3 %v185_v55  ;;  %492 = vmatpush.msra.mxu1 %v200_v57  ;;  %v210_v55 = vld [vmem:[#allocation5 + $0x530] sm:$0xff]  ;;  %v187_v57 = vld [vmem:[#allocation5 + $0x478] sm:$0xff] }
  0x6a   :  { %515 = vmatpush.msra.mxu2 %v49_v60  ;;  %456 = vmatmul.f32.vlgmr.msrb.gmra.mxu3 %v757_v59  ;;  %v74_v60 = vld [vmem:[#allocation5 + $0xf0] sm:$0xff] }
  0x6b   :  { %535 = vmatpush.msra.mxu3 %v177_v61  ;;  %436 = vmatmul.f32.vlgmr.msrb.gmra.mxu2 %v755_v58  ;;  %v202_v61 = vld [vmem:[#allocation5 + $0x4f0] sm:$0xff] }
  0x6c   :  { %580 = vmatpush.msrb.mxu2 %v171_v62  ;;  %473 = vmatpush.msra.mxu0 %v64_v0  ;;  %v51_v62 = vld [vmem:[#allocation5 + $0x38] sm:$0xff]  ;;  %v66_v0 = vld [vmem:[#allocation5 + $0xb0] sm:$0xff] }
  0x6d   :  { %600 = vmatpush.msrb.mxu3 %v299_v63  ;;  %493 = vmatpush.msra.mxu1 %v192_v1  ;;  %v179_v63 = vld [vmem:[#allocation5 + $0x438] sm:$0xff]  ;;  %v194_v1 = vld [vmem:[#allocation5 + $0x4b0] sm:$0xff] }
  0x6e   :  { %581 = vmatpush.msrb.mxu2 %v163_v2  ;;  %474 = vmatpush.msra.mxu0 %v56_v4  ;;  %v58_v2 = vld [vmem:[#allocation5 + $0x70] sm:$0xff] }
  0x6f   :  { %601 = vmatpush.msrb.mxu3 %v291_v3  ;;  %494 = vmatpush.msra.mxu1 %v184_v5  ;;  %v186_v3 = vld [vmem:[#allocation5 + $0x470] sm:$0xff] }
  0x70   :  { %582 = vmatpush.msrb.mxu2 %v155_v6  ;;  %475 = vmatpush.msra.mxu0 %v48_v8  ;;  %v50_v4 = vld [vmem:[#allocation5 + $0x30] sm:$0xff] }
  0x71   :  { %602 = vmatpush.msrb.mxu3 %v283_v7  ;;  %495 = vmatpush.msra.mxu1 %v176_v9  ;;  %v178_v5 = vld [vmem:[#allocation5 + $0x430] sm:$0xff] }
  0x72   :  { %396 = vmatmul.f32.vlgmr.msrb.gmra.mxu0 %v755_v58  ;;  %416 = vmatmul.f32.vlgmr.msrb.gmra.mxu1 %v757_v59 }
  0x73   :  { %540 = vmatpush.msrb.mxu0 %v170_v10  ;;  %560 = vmatpush.msrb.mxu1 %v298_v11 }
  0x74   :  { %583 = vmatpush.msrb.mxu2 %v147_v12  ;;  %603 = vmatpush.msrb.mxu3 %v275_v13 }
  0x75   :  { %541 = vmatpush.msrb.mxu0 %v162_v14  ;;  %561 = vmatpush.msrb.mxu1 %v290_v15 }
  0x76   :  { %584 = vmatpush.msrb.mxu2 %v139_v16  ;;  %604 = vmatpush.msrb.mxu3 %v267_v17 }
  0x77   :  { %542 = vmatpush.msrb.mxu0 %v154_v18  ;;  %562 = vmatpush.msrb.mxu1 %v282_v19 }
  0x78   :  { %585 = vmatpush.msrb.mxu2 %v131_v20  ;;  %605 = vmatpush.msrb.mxu3 %v259_v21 }
  0x79   :  { %543 = vmatpush.msrb.mxu0 %v146_v22  ;;  %563 = vmatpush.msrb.mxu1 %v274_v23 }
  0x7a   :  { %586 = vmatpush.msrb.mxu2 %v123_v24  ;;  %606 = vmatpush.msrb.mxu3 %v251_v25 }
  0x7b   :  { %544 = vmatpush.msrb.mxu0 %v138_v26  ;;  %564 = vmatpush.msrb.mxu1 %v266_v27 }
  0x7c   :  { %587 = vmatpush.msrb.mxu2 %v115_v28  ;;  %607 = vmatpush.msrb.mxu3 %v243_v29 }
  0x7d   :  { %545 = vmatpush.msrb.mxu0 %v130_v30  ;;  %565 = vmatpush.msrb.mxu1 %v258_v31 }
  0x7e   :  { %588 = vmatpush.msrb.mxu2 %v107_v32  ;;  %608 = vmatpush.msrb.mxu3 %v235_v33 }
  0x7f   :  { %546 = vmatpush.msrb.mxu0 %v122_v34  ;;  %566 = vmatpush.msrb.mxu1 %v250_v35 }
  0x80   :  { %589 = vmatpush.msrb.mxu2 %v99_v36  ;;  %609 = vmatpush.msrb.mxu3 %v227_v37 }
  0x81   :  { %547 = vmatpush.msrb.mxu0 %v114_v38  ;;  %567 = vmatpush.msrb.mxu1 %v242_v39 }
  0x82   :  { %590 = vmatpush.msrb.mxu2 %v91_v40  ;;  %610 = vmatpush.msrb.mxu3 %v219_v41 }
  0x83   :  { %548 = vmatpush.msrb.mxu0 %v106_v42  ;;  %568 = vmatpush.msrb.mxu1 %v234_v43 }
  0x84   :  { %591 = vmatpush.msrb.mxu2 %v83_v44  ;;  %611 = vmatpush.msrb.mxu3 %v211_v45 }
  0x85   :  { %516 = vmatmul.f32.vlgmr.msra.gmra.mxu2 %v755_v58  ;;  %536 = vmatmul.f32.vlgmr.msra.gmra.mxu3 %v757_v59 }
  0x86   :  { %549 = vmatpush.msrb.mxu0 %v98_v46  ;;  %569 = vmatpush.msrb.mxu1 %v226_v47 }
  0x87   :  { %592 = vmatpush.msrb.mxu2 %v75_v48  ;;  %612 = vmatpush.msrb.mxu3 %v203_v49 }
  0x88   :  { %550 = vmatpush.msrb.mxu0 %v90_v50  ;;  %570 = vmatpush.msrb.mxu1 %v218_v51 }
  0x89   :  { %593 = vmatpush.msrb.mxu2 %v67_v52  ;;  %613 = vmatpush.msrb.mxu3 %v195_v53 }
  0x8a   :  { %551 = vmatpush.msrb.mxu0 %v82_v54  ;;  %571 = vmatpush.msrb.mxu1 %v210_v55 }
  0x8b   :  { %594 = vmatpush.msrb.mxu2 %v59_v56  ;;  %614 = vmatpush.msrb.mxu3 %v187_v57 }
  0x8c   :  { %476 = vmatmul.f32.vlgmr.msra.gmra.mxu0 %v755_v58  ;;  %496 = vmatmul.f32.vlgmr.msra.gmra.mxu1 %v757_v59 }
  0x8d   :  { %552 = vmatpush.msrb.mxu0 %v74_v60  ;;  %572 = vmatpush.msrb.mxu1 %v202_v61 }
  0x8e   :  { %595 = vmatpush.msrb.mxu2 %v51_v62  ;;  %615 = vmatpush.msrb.mxu3 %v179_v63 }
  0x8f   :  { %596 = vmatmul.f32.vlgmr.msrb.gmra.mxu2 %v755_v58  ;;  %616 = vmatmul.f32.vlgmr.msrb.gmra.mxu3 %v757_v59 }
  0x90   :  { %553 = vmatpush.msrb.mxu0 %v66_v0  ;;  %573 = vmatpush.msrb.mxu1 %v194_v1 }
  0x92   :  { %554 = vmatpush.msrb.mxu0 %v58_v2  ;;  %574 = vmatpush.msrb.mxu1 %v186_v3 }
  0x94   :  { %555 = vmatpush.msrb.mxu0 %v50_v4  ;;  %575 = vmatpush.msrb.mxu1 %v178_v5 }
  0x95   :  { %556 = vmatmul.f32.vlgmr.msrb.gmra.mxu0 %v755_v58  ;;  %576 = vmatmul.f32.vlgmr.msrb.gmra.mxu1 %v757_v59 }
  0xc9   :  { %v377_v7 = vpop.f32.mrf.mxu3 }
  0xca   :  { %v357_v6 = vpop.f32.mrf.mxu2 }
  0xcb   :  { %v317_v8 = vpop.f32.mrf.mxu0  ;;  %v378_v10 = vadd.f32 %v377_v7, %v357_v6 }
  0xcc   :  { %v337_v9 = vpop.f32.mrf.mxu1 }
  0xcd   :  { %v338_v11 = vadd.f32 %v337_v9, %v317_v8  ;;  %621 = vst [vmem:[#allocation7 + $0x8] sm:$0xff] %v378_v10 }
  0xcf   :  { %620 = vst [vmem:[#allocation7] sm:$0xff] %v338_v11 }
  0xed   :  { %v457_v13 = vpop.f32.mrf.mxu3 }
  0xee   :  { %v437_v12 = vpop.f32.mrf.mxu2 }
  0xef   :  { %v397_v14 = vpop.f32.mrf.mxu0  ;;  %v417_v15 = vpop.f32.mrf.mxu1  ;;  %v458_v16 = vadd.f32 %v457_v13, %v437_v12 }
  0xf0   :  { %v418_v17 = vadd.f32 %v417_v15, %v397_v14 }
  0xf1   :  { %623 = vst [vmem:[#allocation7 + $0x18] sm:$0xff] %v458_v16 }
  0xf2   :  { %622 = vst [vmem:[#allocation7 + $0x10] sm:$0xff] %v418_v17 }
 0x108   :  { %v517_v18 = vpop.f32.mrf.mxu2  ;;  %v537_v58 = vpop.f32.mrf.mxu3 }
 0x109   :  { %v477_v19 = vpop.f32.mrf.mxu0  ;;  %v497_v59 = vpop.f32.mrf.mxu1  ;;  %v538_v20 = vadd.f32 %v537_v58, %v517_v18 }
 0x10a   :  { %v498_v21 = vadd.f32 %v497_v59, %v477_v19 }
 0x10b   :  { %625 = vst [vmem:[#allocation7 + $0x28] sm:$0xff] %v538_v20 }
 0x10c   :  { %624 = vst [vmem:[#allocation7 + $0x20] sm:$0xff] %v498_v21 }
 0x112   :  { %v557_v22 = vpop.f32.mrf.mxu0  ;;  %v577_v23 = vpop.f32.mrf.mxu1 }
 0x113   :  { %v578_v24 = vadd.f32 %v577_v23, %v557_v22  ;;  %v597_v25 = vpop.f32.mrf.mxu2  ;;  %v617_v26 = vpop.f32.mrf.mxu3 }
 0x114   :  { %v618_v27 = vadd.f32 %v617_v26, %v597_v25 }
 0x115   :  { %626 = vst [vmem:[#allocation7 + $0x30] sm:$0xff] %v578_v24 }
 0x116   :  { %627 = vst [vmem:[#allocation7 + $0x38] sm:$0xff] %v618_v27 }
 0x117   :  { %638 = dma.vmem_to_hbm [thread:$0]  %s634_s1, 1024, %s636_s23, [#allocation4]  }
 0x118   :  { %727 = dma.done.wait [#allocation4], 1024  }
 0x119   :  { %728 = vsyncadd [#allocation4], 4294966272 }
 0x11a   :  { %643 = vsyncpa [#allocation3], 1 }
 0x11b   :  { %644 = vsyncpa [#allocation6], 1 }
 0x11c   :  { %645 = vsyncpa [#allocation4], 1 }

</bundles_post_ra>
